<compile_context>
chip_gen: v6e
topology: v6e:2x2x1
jax: 0.10.0
libtpu: 0.0.40
codegen_flags: <defaults>
</compile_context>

<pallas_src>
import functools

import jax
import jax.numpy as jnp
from jax import lax
from jax.experimental import pallas as pl
from jax.experimental.pallas import tpu as pltpu


DEFAULT_MASK_VALUE = -0.7 * float(jnp.finfo(jnp.float32).max)


def _attention_head_kernel(x_ref, wqkv_ref, o_ref, *, head_size,
                           approx_reciprocal):
    bb, T, C = x_ref.shape
    H = head_size
    compute_dtype = x_ref.dtype   # wrapper already cast x / wqkv to compute dtype

    x = x_ref[...]                # (bb, T, C)
    w = wqkv_ref[...]             # (C, 3H), column order: q (pre-scaled), k, v

    # Fused QKV projection: one (bb*T, C) @ (C, 3H) MXU pass, f32 accumulation.
    x2 = x.reshape(bb * T, C)
    qkv = jnp.dot(x2, w, preferred_element_type=jnp.float32)    # (bb*T, 3H) f32
    qkv = qkv.reshape(bb, T, 3 * H)

    q = qkv[..., 0 * H:1 * H]     # already scaled by C**-0.5 via the weight
    k = qkv[..., 1 * H:2 * H]
    v = qkv[..., 2 * H:3 * H]

    # Q @ K^T without an explicit transpose: contract the H axes directly.
    s = jnp.einsum('bqh,bkh->bqk',
                   q.astype(compute_dtype), k.astype(compute_dtype),
                   preferred_element_type=jnp.float32)          # (bb, T, T) f32

    # Causal mask == masked_fill(trill[:T,:T] == 0, -inf). Built once as (T, T)
    # and broadcast over batch; large finite fill is robust through exp().
    row = lax.broadcasted_iota(jnp.int32, (T, T), 0)
    col = lax.broadcasted_iota(jnp.int32, (T, T), 1)
    causal = col <= row                                         # (T, T) bool
    s = jnp.where(causal[None, :, :], s, DEFAULT_MASK_VALUE)

    # Numerically stable softmax in f32; reciprocal goes to the EUP slot when
    # approx=True so the VALU only does a multiply.
    m = jnp.max(s, axis=-1, keepdims=True)
    p = jnp.exp(s - m)
    denom = jnp.sum(p, axis=-1, keepdims=True)
    p = p * pl.reciprocal(denom, approx=approx_reciprocal)

    # TODO(synk): dropout is identity in eval mode; training-mode dropout
    # (pltpu.prng_seed + pltpu.prng_random_bits mask on p) is omitted.

    out = jnp.einsum('bqk,bkh->bqh',
                     p.astype(compute_dtype), v.astype(compute_dtype),
                     preferred_element_type=jnp.float32)        # (bb, T, H) f32

    # Lane-dense store: collapse (T, H) -> T*H so the output last dim is a
    # multiple of 128 (128 exactly at T=8, H=16) -> unmasked vst.
    o_ref[...] = out.reshape(bb, T * H).astype(o_ref.dtype)


def _pick_block_b(B, T, C, H, compute_dtype, *, target_grid=1,
                  vmem_budget_bytes=24 << 20):
    """Largest batch block that divides B and fits the VMEM budget.

    target_grid=1 (default): one big step — best on single-TC v5e/v6e where the
    grid is a sequential loop. target_grid=2: keep an (even) grid of >= 2 so a
    2-TC v7x can shard the batch axis across both TensorCores.
    """
    cd = jnp.dtype(compute_dtype).itemsize
    # Per-batch working set: double-buffered x block + out block, plus the f32
    # in-kernel intermediates (qkv, s, p, out accumulator).
    per_b = (2 * T * C * cd                       # x block, x2 double buffer
             + 2 * T * H * 4                      # out block, x2 double buffer
             + 4 * (3 * T * H + 2 * T * T + T * H))
    max_bb = max(1, vmem_budget_bytes // max(per_b, 1))
    min_grid = min(target_grid, B)
    best = 1
    for bb in range(1, B + 1):
        if B % bb == 0 and bb <= max_bb and (B // bb) >= min_grid:
            best = bb
    return best


def attention_head(x, wk, wq, wv, *, compute_dtype=jnp.float32,
                   approx_reciprocal=True, block_b=None, core_parallel=False):
    """x: (B, T, C); wk/wq/wv: (C, H) (PyTorch weight.T) -> (B, T, H)."""
    B, T, C = x.shape
    H = wk.shape[1]
    out_dtype = x.dtype
    scale = float(C) ** -0.5      # matches the module: C ** (-0.5), C = n_embed

    if block_b is None:
        block_b = _pick_block_b(B, T, C, H, compute_dtype,
                                target_grid=2 if core_parallel else 1)
    assert B % block_b == 0, "block_b must divide B"

    # Fuse the three projection weights into one (C, 3H) operand (single weight
    # DMA, one wide matmul) with 1/sqrt(C) folded into the q columns, and cast
    # both operands to the compute dtype ONCE, outside the hot path.
    wqkv = jnp.concatenate([wq * scale, wk, wv], axis=1).astype(compute_dtype)
    x_c = x.astype(compute_dtype)

    kernel = functools.partial(
        _attention_head_kernel,
        head_size=H,
        approx_reciprocal=approx_reciprocal)

    cd_item = jnp.dtype(compute_dtype).itemsize
    out_item = jnp.dtype(out_dtype).itemsize

    # Bytes actually DMA'd: x in compute dtype, wqkv fetched once (constant
    # index_map), output in x.dtype.
    cost = pl.CostEstimate(
        flops=2 * B * (3 * T * C * H + 2 * T * T * H),
        transcendentals=B * T * T + B * T,
        bytes_accessed=cd_item * (B * T * C + C * 3 * H) + out_item * B * T * H)

    # Explicit scoped-VMEM limit: generous headroom over the working set, but
    # capped at 32 MiB (safe on v5e/v6e [128 MiB phys] and v7x [64 MiB phys]).
    working = (block_b * (2 * T * C * cd_item + 2 * T * H * out_item
                          + 4 * (3 * T * H + 2 * T * T + T * H))
               + 2 * C * 3 * H * cd_item)
    vmem_limit = int(min(max(4 * working, 16 << 20), 32 << 20))

    if core_parallel:
        # v7x: 2 TensorCores per chip — only CORE_PARALLEL changes codegen.
        dims = (pltpu.CORE_PARALLEL,)
    else:
        dims = ("parallel",)

    out_flat = pl.pallas_call(
        kernel,
        out_shape=jax.ShapeDtypeStruct((B, T * H), out_dtype),
        grid_spec=pltpu.PrefetchScalarGridSpec(
            num_scalar_prefetch=0,
            grid=(B // block_b,),
            in_specs=[
                pl.BlockSpec((block_b, T, C), lambda b: (b, 0, 0)),
                pl.BlockSpec((C, 3 * H), lambda b: (0, 0)),
            ],
            out_specs=pl.BlockSpec((block_b, T * H), lambda b: (b, 0)),
        ),
        compiler_params=pltpu.CompilerParams(
            dimension_semantics=dims,
            vmem_limit_bytes=vmem_limit),
        cost_estimate=cost,
    )(x_c, wqkv)

    return out_flat.reshape(B, T, H)


def attention_head_ref(x, wk, wq, wv):
    """Pure-JAX reference mirroring the PyTorch forward (eval mode)."""
    B, T, C = x.shape
    k = x @ wk
    q = x @ wq
    v = x @ wv
    s = (q @ jnp.swapaxes(k, -2, -1)) * (C ** -0.5)
    mask = jnp.tril(jnp.ones((T, T), dtype=bool))
    s = jnp.where(mask, s, -jnp.inf)
    p = jax.nn.softmax(s, axis=-1)
    return p @ v


if __name__ == "__main__":
    # Module-consistent small shapes: context_size=T=8, n_embed=32, head_size=16.
    B, T, C, H = 2, 8, 32, 16
    key = jax.random.PRNGKey(0)
    kx, kk, kq, kv = jax.random.split(key, 4)

    x = jax.random.normal(kx, (B, T, C), dtype=jnp.float32)
    # Deterministic "Linear(n_embed, head_size, bias=False)" weights stored as (C, H).
    wk = jax.random.normal(kk, (C, H), dtype=jnp.float32) * (C ** -0.5)
    wq = jax.random.normal(kq, (C, H), dtype=jnp.float32) * (C ** -0.5)
    wv = jax.random.normal(kv, (C, H), dtype=jnp.float32) * (C ** -0.5)

    ref = attention_head_ref(x, wk, wq, wv)

    # 1) Strict correctness: f32 operands, exact reciprocal.
    out_exact = jax.block_until_ready(
        attention_head(x, wk, wq, wv, compute_dtype=jnp.float32,
                       approx_reciprocal=False))
    assert out_exact.shape == (B, T, H)
    assert jnp.allclose(out_exact, ref, atol=1e-5, rtol=1e-5), "exact-path mismatch"

    # 2) Default perf path: f32 operands, approx (EUP) reciprocal.
    out_fast = jax.block_until_ready(attention_head(x, wk, wq, wv))
    assert jnp.allclose(out_fast, ref, atol=5e-3, rtol=5e-3), "approx-path mismatch"

    # 3) bf16 MXU operands + bf16 x DMA (v6e/v7x perf path), f32 accumulation
    #    and f32 softmax math.
    out_bf16 = jax.block_until_ready(
        attention_head(x, wk, wq, wv, compute_dtype=jnp.bfloat16))
    assert jnp.allclose(out_bf16, ref, atol=5e-2, rtol=5e-2), "bf16-path mismatch"

    print("KERNEL_OK")
</pallas_src>

<mosaic_0001>
module attributes {stable_mosaic.version = 11 : i64} {
  func.func @_attention_head_kernel(%arg0: i32, %arg1: memref<2x8x32xf32, #tpu.memory_space<vmem>>, %arg2: memref<32x48xf32, #tpu.memory_space<vmem>>, %arg3: memref<2x128xf32, #tpu.memory_space<vmem>>) attributes {dimension_semantics = [#tpu.dimension_semantics<parallel>], iteration_bounds = array<i64: 1>, scalar_prefetch = 0 : i64, scratch_operands = 0 : i64, tpu.core_type = #tpu.core_type<tc>, window_params = [{transform_indices = @transform_0, window_bounds = array<i64: 2, 8, 32>}, {pipeline_mode = #tpu.pipeline_mode<synchronous>, transform_indices = @transform_1, window_bounds = array<i64: 32, 48>}, {transform_indices = @transform_2, window_bounds = array<i64: 2, 128>}]} {
    %c0 = arith.constant 0 : index
    %c0_0 = arith.constant 0 : index
    %c0_1 = arith.constant 0 : index
    %0 = vector.load %arg1[%c0, %c0_0, %c0_1] : memref<2x8x32xf32, #tpu.memory_space<vmem>>, vector<2x8x32xf32>
    %c0_2 = arith.constant 0 : index
    %c0_3 = arith.constant 0 : index
    %1 = vector.load %arg2[%c0_2, %c0_3] : memref<32x48xf32, #tpu.memory_space<vmem>>, vector<32x48xf32>
    %2 = vector.shape_cast %0 : vector<2x8x32xf32> to vector<16x32xf32>
    %cst = arith.constant dense<0.000000e+00> : vector<16x48xf32>
    %3 = tpu.matmul %2, %1, %cst {dimension_numbers = #tpu.dot_dimension_numbers<[1], [0], [0], [1], [0, 0, 1, 1], [], []>} : vector<16x32xf32>, vector<32x48xf32>, vector<16x48xf32> -> vector<16x48xf32>
    %4 = vector.shape_cast %3 : vector<16x48xf32> to vector<2x8x48xf32>
    %5 = vector.extract_strided_slice %4 {offsets = [0, 0, 0], sizes = [2, 8, 16], strides = [1, 1, 1]} : vector<2x8x48xf32> to vector<2x8x16xf32>
    %6 = vector.extract_strided_slice %4 {offsets = [0, 0, 16], sizes = [2, 8, 16], strides = [1, 1, 1]} : vector<2x8x48xf32> to vector<2x8x16xf32>
    %7 = vector.extract_strided_slice %4 {offsets = [0, 0, 32], sizes = [2, 8, 16], strides = [1, 1, 1]} : vector<2x8x48xf32> to vector<2x8x16xf32>
    "tpu.trace_start"() <{level = 10 : i32, message = "bqh,bkh->bqk"}> : () -> ()
    %cst_4 = arith.constant dense<0.000000e+00> : vector<2x8x8xf32>
    %8 = tpu.matmul %5, %6, %cst_4 {dimension_numbers = #tpu.dot_dimension_numbers<[2], [2], [1], [1], [0, 0, 0, 1, 1, 1], [0], [0]>} : vector<2x8x16xf32>, vector<2x8x16xf32>, vector<2x8x8xf32> -> vector<2x8x8xf32>
    "tpu.trace_stop"() : () -> ()
    %9 = tpu.iota {dimensions = array<i32: 0>} : vector<8x8xi32>
    %10 = tpu.iota {dimensions = array<i32: 1>} : vector<8x8xi32>
    %11 = arith.cmpi sle, %10, %9 : vector<8x8xi32>
    %12 = vector.shape_cast %11 : vector<8x8xi1> to vector<1x8x8xi1>
    %cst_5 = arith.constant -2.38197633E+38 : f32
    %13 = vector.shape_cast %12 : vector<1x8x8xi1> to vector<1x8x8xi1>
    %14 = vector.broadcast %13 : vector<1x8x8xi1> to vector<2x8x8xi1>
    %15 = vector.broadcast %cst_5 : f32 to vector<2x8x8xf32>
    %16 = arith.select %14, %8, %15 : vector<2x8x8xi1>, vector<2x8x8xf32>
    %cst_6 = arith.constant dense<0xFF800000> : vector<2x8xf32>
    %17 = vector.multi_reduction <maximumf>, %16, %cst_6 [2] : vector<2x8x8xf32> to vector<2x8xf32>
    %18 = vector.shape_cast %17 : vector<2x8xf32> to vector<2x8x1xf32>
    %19 = vector.broadcast %18 : vector<2x8x1xf32> to vector<2x8x8xf32>
    %20 = arith.subf %16, %19 : vector<2x8x8xf32>
    %21 = math.exp %20 : vector<2x8x8xf32>
    %cst_7 = arith.constant dense<0.000000e+00> : vector<2x8xf32>
    %22 = vector.multi_reduction <add>, %21, %cst_7 [2] : vector<2x8x8xf32> to vector<2x8xf32>
    %23 = vector.shape_cast %22 : vector<2x8xf32> to vector<2x8x1xf32>
    %24 = tpu.reciprocal %23 : vector<2x8x1xf32> -> vector<2x8x1xf32>
    %25 = vector.broadcast %24 : vector<2x8x1xf32> to vector<2x8x8xf32>
    %26 = arith.mulf %21, %25 : vector<2x8x8xf32>
    "tpu.trace_start"() <{level = 10 : i32, message = "bqk,bkh->bqh"}> : () -> ()
    %cst_8 = arith.constant dense<0.000000e+00> : vector<2x8x16xf32>
    %27 = tpu.matmul %26, %7, %cst_8 {dimension_numbers = #tpu.dot_dimension_numbers<[2], [1], [1], [2], [0, 0, 0, 1, 1, 2], [0], [0]>} : vector<2x8x8xf32>, vector<2x8x16xf32>, vector<2x8x16xf32> -> vector<2x8x16xf32>
    "tpu.trace_stop"() : () -> ()
    %28 = vector.shape_cast %27 : vector<2x8x16xf32> to vector<2x128xf32>
    %c0_9 = arith.constant 0 : index
    %c0_10 = arith.constant 0 : index
    %29 = vector.load %arg3[%c0_9, %c0_10] : memref<2x128xf32, #tpu.memory_space<vmem>>, vector<2x128xf32>
    tpu.vector_store %arg3[%c0_9, %c0_10], %28 {strides = array<i32>} : memref<2x128xf32, #tpu.memory_space<vmem>>, vector<2x128xf32>,
    return
  }
  func.func @transform_0(%arg0: i32) -> (i32, i32, i32) {
    %c0_i32 = arith.constant 0 : i32
    %c0_i32_0 = arith.constant 0 : i32
    %c0_i32_1 = arith.constant 0 : i32
    return %arg0, %c0_i32, %c0_i32_0 : i32, i32, i32
  }
  func.func @transform_1(%arg0: i32) -> (i32, i32) {
    %c0_i32 = arith.constant 0 : i32
    %c0_i32_0 = arith.constant 0 : i32
    %c0_i32_1 = arith.constant 0 : i32
    return %c0_i32, %c0_i32_0 : i32, i32
  }
  func.func @transform_2(%arg0: i32) -> (i32, i32) {
    %c0_i32 = arith.constant 0 : i32
    %c0_i32_0 = arith.constant 0 : i32
    return %arg0, %c0_i32 : i32, i32
  }
}

</mosaic_0001>

<bundles_post_ra>
// kernel: tpu_custom_call.1
= control target key start
LH: loop header
LB: loop body
LE: loop exit
PB: predicated region body
PF: predicated region fallthrough
CT: control target
= control target key end

     0   :  { %7 = vsyncpa [#allocation3], 0  ;;  %s811_s0 = inlined_call_operand.hbm [shape: f32[2,8,32], index: 0, kind: input, shape index: {}]   ;;  %s812_s1 = inlined_call_operand.hbm [shape: f32[32,48], index: 1, kind: input, shape index: {}]   ;;  %s813_s2 = inlined_call_operand.hbm [shape: f32[2,128], index: 2, kind: output, shape index: {}]  }
   0x1   :  { %8 = vsyncpa [#allocation6], 0 }
   0x2   :  { %9 = vsyncpa [#allocation4], 0  ;;  %s733_s9 = smov [#allocation2]  }
   0x3   :  { %s15_s10 = sshll.u32 %s733_s9, 4  ;;  %s16_s10 = int_to_ptr.vmem [resolvable:$true] %s15_s10 }
   0x4   :  { %s675_s11 = scalar_lea.vmem %s16_s10, 256  ;;  %p680_p1 = scmp.lt.s32.totalorder %s16_s10, %s16_s10 }
   0x5   :  { %p676_p0 = scmp.ne.s32.totalorder %s16_s10, %s675_s11  ;;  %p681_p2 = scmp.lt.s32.totalorder %s675_s11, %s675_s11 }
   0x7   :  { %p682_p3 = por %p681_p2, %p680_p1 }
   0x9   :  { %p683_p4 = pnand %p682_p3, %p676_p0 }
   0xb   :  { %686 = shalt.err (!%p683_p4)
}
   0xc   :  { %s734_s12 = smov 128   ;;  %s735_s13 = smov 8  }
   0xd   :  { %21 = dma.hbm_to_vmem [thread:$0]  %s811_s0, 256, %s16_s10, [#allocation3], %s734_s12, %s734_s12, %s735_s13  }
   0xe   :  { %s736_s16 = smov [#allocation5]  }
   0xf   :  { %s27_s17 = sshll.u32 %s736_s16, 4  ;;  %s28_s17 = int_to_ptr.vmem [resolvable:$true] %s27_s17 }
  0x10   :  { %s695_s18 = scalar_lea.vmem %s28_s17, 512  ;;  %p700_p6 = scmp.lt.s32.totalorder %s28_s17, %s28_s17 }
  0x11   :  { %p696_p5 = scmp.ne.s32.totalorder %s28_s17, %s695_s18  ;;  %p701_p7 = scmp.lt.s32.totalorder %s695_s18, %s695_s18 }
  0x13   :  { %p702_p8 = por %p701_p7, %p700_p6 }
  0x15   :  { %p703_p9 = pnand %p702_p8, %p696_p5 }
  0x17   :  { %706 = shalt.err (!%p703_p9)
}
  0x18   :  { %33 = dma.hbm_to_vmem [thread:$0]  %s812_s1, 512, %s28_s17, [#allocation6], %s734_s12, %s734_s12, %s735_s13  }
  0x19   :  { %727 = dma.done.wait [#allocation3], 256  }
  0x1a   :  { %728 = vsyncadd [#allocation3], 4294967040 }
  0x1b   :  { %729 = dma.done.wait [#allocation6], 512  }
  0x1c   :  { %730 = vsyncadd [#allocation6], 4294966784  ;;  %vm46_vm0 = vcmask 261120   ;;  %v45_v0 = vld [vmem:[#allocation5 + $0x18] sm:$0xff]  ;;  %v44_v1 = vld [vmem:[#allocation5 + $0x10] sm:$0xff]  ;;  %v737_v6 = vmov 0.0   ;;  %v283_v11 = vlaneseq }
  0x1d   :  { %612 = vmatprep.subr.mxu0 %v45_v0  ;;  %v40_v2 = vld [vmem:[#allocation2] sm:$0xff]  ;;  %v43_v3 = vld [vmem:[#allocation5 + $0x8] sm:$0xff]  ;;  %v42_v4 = vld [vmem:[#allocation5] sm:$0xff]  ;;  %623 = vmatprep.subr.mxu1 %v737_v6  ;;  %vm738_vm1 = vmmov 0   ;;  %s739_s0 = smov 112   ;;  %vm131_vm2 = vcmask 130048  }
  0x1e   :  { %613 = vmatpush3.msra.mxu0 %v45_v0  ;;  %620 = vmatprep.mubr.msk.f32.mxu0 %vm46_vm0, %v40_v2  ;;  %v41_v5 = vld [vmem:[#allocation2 + $0x8] sm:$0xff]  ;;  %v284_v12 = vshrl.u32 %v283_v11, 7  ;;  %v286_v13 = vand.u32 127, %v283_v11  ;;  %vm292_vm4 = vcmask 64512   ;;  %s740_s1 = smov 96   ;;  %s743_s21 = smov 32  }
  0x1f   :  { %614 = vmatprep.subr.mxu0 %v44_v1  ;;  %625 = vmatprep.mubr.msk.f32.mxu1 %vm738_vm1, %v737_v6  ;;  %v741_v40 = vmov 1983009808   ;;  %v742_v42 = vmov 1934713408   ;;  %s744_s22 = smov 48   ;;  %s745_s23 = smov 16  }
  0x20   :  { %615 = vmatpush3.msra.mxu0 %v44_v1  ;;  %vm287_vm3 = vcmp.le.s32.totalorder %v286_v13, %v284_v12  ;;  %v469_v41 = vunpack.c.l.s4 %v741_v40  ;;  %v500_v43 = vunpack.c.l.s4 %v742_v42  ;;  %s746_s24 = smov 64   ;;  %s747_s25 = smov 80   ;;  %vm563_vm5 = vcmask 392192  }
  0x21   :  { %616 = vmatprep.subr.mxu0 %v43_v3  ;;  %vm565_vm6 = vcmask 523264   ;;  %vm567_vm7 = vcmask 654336   ;;  %vm569_vm8 = vcmask 785408   ;;  %s748_s26 = smov [#allocation7]   ;;  %vm571_vm9 = vcmask 916480  }
  0x22   :  { %617 = vmatpush3.msra.mxu0 %v43_v3  ;;  %v470_v44 = vunpack.c.0.s8 %v469_v41  ;;  %v501_v46 = vunpack.c.0.s8 %v500_v43  ;;  %s580_s27 = sshll.u32 %s748_s26, 4  ;;  %s581_s27 = int_to_ptr.vmem [resolvable:$true] %s580_s27 }
  0x23   :  { %618 = vmatprep.subr.mxu0 %v42_v4  ;;  %s707_s28 = scalar_lea.vmem %s581_s27, 32  ;;  %p712_p11 = scmp.lt.s32.totalorder %s581_s27, %s581_s27 }
  0x24   :  { %619 = vmatpush3.msra.mxu0 %v42_v4  ;;  %v473_v47 = vsub.s32 %v470_v44, %v284_v12  ;;  %v504_v50 = vsub.s32 %v501_v46, %v284_v12  ;;  %p708_p10 = scmp.ne.s32.totalorder %s581_s27, %s707_s28  ;;  %p713_p12 = scmp.lt.s32.totalorder %s707_s28, %s707_s28 }
  0x25   :  { %621 = vmatmul.mubr.msk.f32.vlgmr.msra.gmra.mxu0 %vm46_vm0, %v41_v5  ;;  %633 = vmatprep.subr.mxu0 %v737_v6 }
  0x26   :  { %635 = vmatprep.mubr.msk.f32.mxu0 %vm738_vm1, %v737_v6  ;;  %p714_p13 = por %p713_p12, %p712_p11 }
  0x28   :  { %p715_p0 = pnand %p714_p13, %p708_p10 }
  0xe5   :  { %v622_v7 = vpop.f32.mrf.mxu0 }
  0xe7   :  { %v119_v8 = vpop.f32.mrf.mxu0 }
  0xe8   :  { %129 = vrot.lane.b32.xlu0 %v119_v8, %s739_s0 }
  0xec   :  { %207 = vrot.lane.b32.xlu0 %v622_v7, %s739_s0 }
 0x15a   :  { %v130_v9 = vpop.permute.xlu0 %129 }
 0x15b   :  { %624 = vmatpush3.xpose.msk.msra.mxu1 %vm131_vm2, %v130_v9 }
 0x15c   :  { %628 = vmatprep.subr.mxu1 %v737_v6 }
 0x15e   :  { %626 = vmatmul.mubr.msk.f32.vlgmr.msra.gmra.mxu1 %vm131_vm2, %v119_v8  ;;  %v208_v10 = vpop.permute.xlu0 %207 }
 0x15f   :  { %629 = vmatpush3.xpose.msk.msra.mxu1 %vm131_vm2, %v208_v10  ;;  %630 = vmatprep.mubr.msk.f32.mxu1 %vm738_vm1, %v737_v6 }
 0x160   :  { %638 = vmatprep.subr.mxu1 %v737_v6 }
 0x162   :  { %631 = vmatmul.mubr.msk.f32.vlgmr.msra.gmra.mxu1 %vm131_vm2, %v622_v7 }
 0x163   :  { %640 = vmatprep.mubr.msk.f32.mxu1 %vm738_vm1, %v737_v6 }
 0x21e   :  { %v202_v14 = vpop.f32.mrf.mxu1 }
 0x21f   :  { %v290_v15 = vsel %vm287_vm3, %v202_v14, -2.3819763e+38 }
 0x220   :  { %v627_v16 = vpop.f32.mrf.mxu1  ;;  %v293_v17 = vsel %vm292_vm4, %v290_v15, -inf }
 0x221   :  { %294 = vmax.xlane.f32.xlu1 %v293_v17 }
 0x222   :  { %v279_v18 = vpop.f32.mrf.mxu1 }
 0x223   :  { %v291_v19 = vsel %vm287_vm3, %v279_v18, -2.3819763e+38 }
 0x224   :  { %v632_v20 = vpop.f32.mrf.mxu1  ;;  %v296_v21 = vsel %vm292_vm4, %v291_v19, -inf }
 0x225   :  { %297 = vmax.xlane.f32.xlu1 %v296_v21 }
 0x236   :  { %315 = vrot.lane.b32.xlu1 %v119_v8, %s740_s1 }
 0x2aa   :  { %v295_v22 = vpop.xlane.xlu1 %294 }
 0x2ab   :  { %v299_v23 = vsub.f32 %v290_v15, %v295_v22 }
 0x2ad   :  { %v301_v24 = vmul.f32 1.442695, %v299_v23 }
 0x2ae   :  { %v298_v25 = vpop.xlane.xlu1 %297 }
 0x2af   :  { %659 = vpow2.f32 %v301_v24  ;;  %v300_v26 = vsub.f32 %v291_v19, %v298_v25 }
 0x2b1   :  { %v303_v27 = vmul.f32 1.442695, %v300_v26 }
 0x2b2   :  { %v316_v28 = vpop.permute.xlu1 %315 }
 0x2b3   :  { %661 = vpow2.f32 %v303_v27  ;;  %634 = vmatpush3.msra.mxu0 %v316_v28 }
 0x2bc   :  { %v660_v29 = vpop.eup %659 }
 0x2bd   :  { %v305_v30 = vsel %vm292_vm4, %v660_v29, 0.0 }
 0x2be   :  { %306 = vadd.xlane.f32.xlu0 %v305_v30 }
 0x2c0   :  { %v662_v31 = vpop.eup %661 }
 0x2c1   :  { %v308_v32 = vsel %vm292_vm4, %v662_v31, 0.0 }
 0x2c2   :  { %309 = vadd.xlane.f32.xlu1 %v308_v32 }
 0x2d3   :  { %391 = vrot.lane.b32.xlu1 %v622_v7, %s740_s1 }
 0x347   :  { %v307_v33 = vpop.xlane.xlu0 %306 }
 0x348   :  { %663 = vrcp.f32 %v307_v33 }
 0x34b   :  { %v310_v34 = vpop.xlane.xlu1 %309 }
 0x34c   :  { %665 = vrcp.f32 %v310_v34 }
 0x34f   :  { %v392_v35 = vpop.permute.xlu1 %391 }
 0x350   :  { %639 = vmatpush3.msra.mxu1 %v392_v35 }
 0x355   :  { %v664_v36 = vpop.eup %663 }
 0x356   :  { %v313_v37 = vmul.f32 %v664_v36, %v660_v29 }
 0x358   :  { %636 = vmatmul.mubr.msk.f32.vlgmr.msra.gmra.mxu0 %vm292_vm4, %v313_v37 }
 0x359   :  { %v666_v38 = vpop.eup %665 }
 0x35a   :  { %v314_v39 = vmul.f32 %v666_v38, %v662_v31 }
 0x35c   :  { %641 = vmatmul.mubr.msk.f32.vlgmr.msra.gmra.mxu1 %vm292_vm4, %v314_v39 }
 0x418   :  { %v387_v45 = vpop.f32.mrf.mxu0 }
 0x419   :  { %v474_v51 = vrot.slane %v387_v45, %v473_v47  ;;  %v467_v55 = vcombine.high %v387_v45, %v737_v6 }
 0x41a   :  { %v637_v48 = vpop.f32.mrf.mxu0 }
 0x41b   :  { %v481_v61 = vrot.slane %v467_v55, %v473_v47 }
 0x41c   :  { %v463_v49 = vpop.f32.mrf.mxu1 }
 0x41d   :  { %v482_v52 = vcombine.high %v463_v49, %v737_v6  ;;  %v489_v53 = vrot.slane %v463_v49, %v473_v47 }
 0x41e   :  { %v642_v54 = vpop.f32.mrf.mxu1 }
 0x41f   :  { %v497_v56 = vcombine.low %v474_v51, %v489_v53  ;;  %v498_v57 = vcombine.high %v474_v51, %v489_v53  ;;  %v496_v58 = vrot.slane %v482_v52, %v473_v47 }
 0x421   :  { %v505_v59 = vrot.slane %v497_v56, %v504_v50  ;;  %v512_v60 = vrot.slane %v498_v57, %v504_v50  ;;  %v513_v63 = vcombine.low %v481_v61, %v496_v58  ;;  %v514_v1 = vcombine.high %v481_v61, %v496_v58 }
 0x423   :  { %538 = vrot.lane.b32.xlu1 %v512_v60, %s743_s21  ;;  %v530_v62 = vcombine.high %v512_v60, %v737_v6  ;;  %v529_v0 = vcombine.high %v505_v59, %v737_v6  ;;  %v521_v2 = vrot.slane %v513_v63, %v504_v50  ;;  %v528_v3 = vrot.slane %v514_v1, %v504_v50 }
 0x425   :  { %542 = vrot.lane.b32.xlu0 %v530_v62, %s744_s22  ;;  %v531_v4 = vcombine.high %v521_v2, %v737_v6  ;;  %v532_v5 = vcombine.high %v528_v3, %v737_v6 }
 0x427   :  { %534 = vrot.lane.b32.xlu1 %v529_v0, %s745_s23 }
 0x42b   :  { %546 = vrot.lane.b32.xlu1 %v521_v2, %s746_s24 }
 0x42f   :  { %554 = vrot.lane.b32.xlu1 %v528_v3, %s740_s1 }
 0x433   :  { %550 = vrot.lane.b32.xlu1 %v531_v4, %s747_s25 }
 0x437   :  { %558 = vrot.lane.b32.xlu1 %v532_v5, %s739_s0 }
 0x495   :  { %v539_v7 = vpop.permute.xlu1 %538 }
 0x497   :  { %v543_v12 = vpop.permute.xlu0 %542 }
 0x499   :  { %v535_v8 = vpop.permute.xlu1 %534 }
 0x49a   :  { %v561_v9 = vsel %vm131_vm2, %v505_v59, %v535_v8 }
 0x49b   :  { %v562_v11 = vsel %vm46_vm0, %v561_v9, %v539_v7 }
 0x49c   :  { %v564_v14 = vsel %vm563_vm5, %v562_v11, %v543_v12 }
 0x49d   :  { %v547_v10 = vpop.permute.xlu1 %546 }
 0x49e   :  { %v566_v15 = vsel %vm565_vm6, %v564_v14, %v547_v10 }
 0x4a1   :  { %v555_v13 = vpop.permute.xlu1 %554 }
 0x4a5   :  { %v551_v16 = vpop.permute.xlu1 %550 }
 0x4a6   :  { %v568_v17 = vsel %vm567_vm7, %v566_v15, %v551_v16 }
 0x4a7   :  { %v570_v6 = vsel %vm569_vm8, %v568_v17, %v555_v13 }
 0x4a9   :  { %v559_v18 = vpop.permute.xlu1 %558 }
 0x4aa   :  { %v572_v19 = vsel %vm571_vm9, %v570_v6, %v559_v18 }
 0x4ab   :  { %573 = vst [vmem:[#allocation7] sm:$0x3] %v572_v19 }
 0x4ac   :  { %718 = shalt.err (!%p715_p0)
}
 0x4ad   :  { %583 = dma.vmem_to_hbm [thread:$0]  %s581_s27, 32, %s813_s2, [#allocation4]  }
 0x4ae   :  { %731 = dma.done.wait [#allocation4], 32  }
 0x4af   :  { %732 = vsyncadd [#allocation4], 4294967264 }
 0x4b0   :  { %587 = vsyncpa [#allocation3], 1 }
 0x4b1   :  { %588 = vsyncpa [#allocation6], 1 }
 0x4b2   :  { %589 = vsyncpa [#allocation4], 1 }

</bundles_post_ra>
